<compile_context>
chip_gen: v5e
topology: v5e:2x2
jax: 0.10.0
libtpu: 0.0.40
codegen_flags: <defaults>
</compile_context>

<pallas_src>
import numpy as np
import jax
import jax.numpy as jnp
from jax.experimental import pallas as pl
from jax.experimental.pallas import tpu as pltpu


# ----------------------------------------------------------------------------
# Glue: block-Hankel construction (identical to deepc_hunt.utils.block_hankel)
# ----------------------------------------------------------------------------
def block_hankel(w: np.ndarray, L: int, d: int) -> np.ndarray:
    """w: flat signal of shape (d*T,) -> Hankel matrix of shape (L*d, T-L+1)."""
    T = w.shape[0] // d
    cols = T - L + 1
    idx = np.arange(L * d)[None, :] + d * np.arange(cols)[:, None]   # (cols, L*d)
    return w[idx].T                                                  # (L*d, cols)


def _round_up(x: int, mult: int) -> int:
    return ((x + mult - 1) // mult) * mult


# ----------------------------------------------------------------------------
# Pallas kernel: the QP solution is 4 small MXU matmuls summed into one
# lane-dense padded output tile:
#   out[tb, :] = yref @ M_yref + uref @ M_uref + u_ini @ M_uini + y_ini @ M_yini
# Column layout of out: [ u_opt (Nm) | 0-pad to 128k | y_opt (Np) | 0-pad ]
# ----------------------------------------------------------------------------
def deepc_kernel(yref_ref, uref_ref, uini_ref, yini_ref,
                 m_yref_ref, m_uref_ref, m_uini_ref, m_yini_ref, out_ref):
    acc = jnp.dot(yref_ref[...], m_yref_ref[...],
                  preferred_element_type=jnp.float32)
    acc = acc + jnp.dot(uref_ref[...], m_uref_ref[...],
                        preferred_element_type=jnp.float32)
    acc = acc + jnp.dot(uini_ref[...], m_uini_ref[...],
                        preferred_element_type=jnp.float32)
    acc = acc + jnp.dot(yini_ref[...], m_yini_ref[...],
                        preferred_element_type=jnp.float32)
    out_ref[...] = acc.astype(out_ref.dtype)


# ----------------------------------------------------------------------------
# DeePC module: offline float64 folding + Pallas forward
# ----------------------------------------------------------------------------
class DeePCPallas:
    def __init__(self, ud, yd, N, Tini, p, m, n_batch, key):
        self.T = ud.shape[0]
        self.N, self.Tini, self.p, self.m = N, Tini, p, m
        self.n_batch = n_batch

        # Deterministic parameter init (mirrors torch: q ~ 100 + 0.01*N(0,1),
        # r ~ 0.01 + 0.001*N(0,1)).
        kq, kr = jax.random.split(key)
        q = np.asarray(100.0 + 0.01 * jax.random.normal(kq, (p,), jnp.float32),
                       np.float64)
        r = np.asarray(0.01 + 0.001 * jax.random.normal(kr, (m,), jnp.float32),
                       np.float64)

        ud_np = np.asarray(ud, np.float64).reshape(m * self.T)
        yd_np = np.asarray(yd, np.float64).reshape(p * self.T)

        H = block_hankel(ud_np, Tini + N + p, m)
        if np.linalg.matrix_rank(H) != H.shape[0]:
            raise ValueError("Data is not persistently exciting")

        U = block_hankel(ud_np, Tini + N, m)
        Y = block_hankel(yd_np, Tini + N, p)
        Up = U[: m * Tini, :]
        Uf = U[m * Tini:, :]
        Yp = Y[: p * Tini, :]
        Yf = Y[p * Tini:, :]

        gd = self.T - Tini - N + 1
        self.gd = gd
        Tm, Tp = Tini * m, Tini * p
        Nm, Np = N * m, N * p
        self.Nm, self.Np, self.Tm, self.Tp = Nm, Np, Tm, Tp

        # Q = diag(kron(ones(N), q)), R = diag(kron(ones(N), r))
        qvec = np.tile(q, N)            # (N*p,)
        rvec = np.tile(r, N)            # (N*m,)

        # Equality-constrained QP:
        #   min_g (Yf g - yref)^T Q (..) + (Uf g - uref)^T R (..)
        #   s.t.  Up g = u_ini, Yp g = y_ini
        Wy = qvec[:, None] * Yf                          # (Np, gd)
        Wu = rvec[:, None] * Uf                          # (Nm, gd)
        Hm = Yf.T @ Wy + Uf.T @ Wu                       # (gd, gd)
        A = np.concatenate([Up, Yp], axis=0)             # (Tm+Tp, gd)
        nA = A.shape[0]
        KKT = np.block([[Hm, A.T],
                        [A, np.zeros((nA, nA), np.float64)]])
        # TODO(synk): the SVD-based pseudo-inverse and the u/y box constraints
        # (and the stochastic/nonlinear regularizers) of the original
        # CvxpyLayer QP have no clean Pallas equivalent; pinv runs offline in
        # float64 numpy and box constraints are assumed inactive.
        Kg = np.linalg.pinv(KKT)[:gd, :]                 # (gd, gd + nA)

        Kf = Kg[:, :gd].T                                # (gd, gd)
        Ku = Kg[:, gd:gd + Tm].T                         # (Tm, gd)
        Ky = Kg[:, gd + Tm:].T                           # (Tp, gd)

        # ---- Fold the call-invariant chain into 4 row blocks of one linear
        # map with a lane-dense, 128-aligned output column layout:
        #   cols [0, Nm)        -> u_opt
        #   cols [Fu, Fu + Np)  -> y_opt        (Fu = round_up(Nm, 128))
        Fu = _round_up(Nm, 128)
        Fy = _round_up(Np, 128)
        Fout_pad = Fu + Fy
        self.Fu, self.Fout_pad = Fu, Fout_pad

        def pad_cols(block_u, block_y):
            out = np.zeros((block_u.shape[0], Fout_pad), np.float64)
            out[:, :Nm] = block_u
            out[:, Fu:Fu + Np] = block_y
            return out

        Gy = Wy @ Kf                                     # (Np, gd)
        Gu = Wu @ Kf                                     # (Nm, gd)
        M_yref = pad_cols(Gy @ Uf.T, Gy @ Yf.T)          # (Np, Fout_pad)
        M_uref = pad_cols(Gu @ Uf.T, Gu @ Yf.T)          # (Nm, Fout_pad)
        M_uini = pad_cols(Ku @ Uf.T, Ku @ Yf.T)          # (Tm, Fout_pad)
        M_yini = pad_cols(Ky @ Uf.T, Ky @ Yf.T)          # (Tp, Fout_pad)
        # Kept float32 on purpose (see header note on bf16 / conditioning).
        self._M_blocks = tuple(jnp.asarray(Mb, jnp.float32)
                               for Mb in (M_yref, M_uref, M_uini, M_yini))

        # keep float64 unfolded pieces for the reference path
        self._ref64 = dict(Wy=Wy, Wu=Wu, Kf=Kf, Ku=Ku, Ky=Ky,
                           UfT=Uf.T, YfT=Yf.T)

        # ---- Batch tiling: sublane-pad B, pick a VMEM-safe batch tile ------
        Fin = Np + Nm + Tm + Tp
        B = n_batch
        B8 = _round_up(B, 8)                              # full f32 sublanes
        vmem_budget = 24 * 1024 * 1024                    # conservative sizing
        m_bytes = 2 * Fin * Fout_pad * 4                  # resident M (x2 safety)
        per_row = 2 * (Fin + Fout_pad) * 4                # dbl-buffered in + out
        tb_cap = max(8, ((max(vmem_budget - m_bytes, 0) // per_row) // 8) * 8)
        TB = max(8, min(B8, 512, tb_cap))
        TB = (TB // 8) * 8
        B_pad = _round_up(B8, TB)
        self.B, self.B_pad, self.TB = B, B_pad, TB

        # ---- Build the Pallas callable ONCE (static shapes) ----------------
        grid = (B_pad // TB,)

        def bspec(feat):      # batched input tile: (TB, feat), feat = full dim
            return pl.BlockSpec((TB, feat), lambda i: (i, 0))

        def mspec(rows):      # VMEM-resident M row block (same block each step)
            return pl.BlockSpec((rows, Fout_pad), lambda i: (0, 0))

        flops = 2 * B_pad * Fin * Fout_pad
        bytes_accessed = 4 * (B_pad * Fin + Fin * Fout_pad + B_pad * Fout_pad)

        pallas_fn = pl.pallas_call(
            deepc_kernel,
            out_shape=jax.ShapeDtypeStruct((B_pad, Fout_pad), jnp.float32),
            grid=grid,
            in_specs=[bspec(Np), bspec(Nm), bspec(Tm), bspec(Tp),
                      mspec(Np), mspec(Nm), mspec(Tm), mspec(Tp)],
            out_specs=pl.BlockSpec((TB, Fout_pad), lambda i: (i, 0)),
            compiler_params=pltpu.CompilerParams(
                dimension_semantics=("parallel",),      # shards batch tiles on v7x
                vmem_limit_bytes=32 * 1024 * 1024),
            cost_estimate=pl.CostEstimate(flops=flops, transcendentals=0,
                                          bytes_accessed=bytes_accessed),
        )

        def _fwd(m_blocks, yref, uref, u_ini, y_ini):
            # Sublane/tile padding of the batch (no-op when B == B_pad).
            def bpad(x):
                if B_pad != B:
                    return jnp.pad(x, ((0, B_pad - B), (0, 0)))
                return x
            out = pallas_fn(bpad(yref), bpad(uref), bpad(u_ini), bpad(y_ini),
                            *m_blocks)                      # (B_pad, Fout_pad)
            # Both slices start on lane-aligned offsets (0 and Fu = k*128).
            return out[:B, :Nm], out[:B, Fu:Fu + Np]

        self._forward = jax.jit(_fwd)

    def forward(self, yref, uref, u_ini, y_ini):
        # TODO(synk): no custom_vjp is exposed; gradients through the offline-
        # folded map (training q/r as in DeePC-Hunt) do not flow through this
        # kernel.
        u_opt, y_opt = self._forward(self._M_blocks, yref, uref, u_ini, y_ini)
        return [u_opt, y_opt]

    # float64 unfolded reference of the same math (for verification)
    def forward_ref(self, yref, uref, u_ini, y_ini):
        r = self._ref64
        yref = np.asarray(yref, np.float64)
        uref = np.asarray(uref, np.float64)
        u_ini = np.asarray(u_ini, np.float64)
        y_ini = np.asarray(y_ini, np.float64)
        f = yref @ r["Wy"] + uref @ r["Wu"]
        g = f @ r["Kf"] + u_ini @ r["Ku"] + y_ini @ r["Ky"]
        return [g @ r["UfT"], g @ r["YfT"]]


# ----------------------------------------------------------------------------
if __name__ == "__main__":
    key = jax.random.PRNGKey(0)
    k_ud, k_yd, k_param, k_yref, k_uref, k_uini, k_yini = jax.random.split(key, 7)

    # Small, module-consistent shapes.
    T, Tini, N, p, m, n_batch = 64, 4, 8, 2, 2, 2

    ud = jax.random.normal(k_ud, (T, m), jnp.float32)   # persistently exciting w.h.p.
    yd = jax.random.normal(k_yd, (T, p), jnp.float32)

    # Very wide box constraints -> inactive (kernel handles the equality-constrained QP).
    ctrl = DeePCPallas(ud, yd, N=N, Tini=Tini, p=p, m=m, n_batch=n_batch, key=k_param)

    yref = jax.random.normal(k_yref, (n_batch, N * p), jnp.float32)
    uref = jax.random.normal(k_uref, (n_batch, N * m), jnp.float32)
    u_ini = jax.random.normal(k_uini, (n_batch, Tini * m), jnp.float32)
    y_ini = jax.random.normal(k_yini, (n_batch, Tini * p), jnp.float32)

    u_opt, y_opt = ctrl.forward(yref, uref, u_ini, y_ini)
    jax.block_until_ready((u_opt, y_opt))

    u_ref, y_ref = ctrl.forward_ref(yref, uref, u_ini, y_ini)
    np.testing.assert_allclose(np.asarray(u_opt), u_ref, rtol=2e-3, atol=2e-3)
    np.testing.assert_allclose(np.asarray(y_opt), y_ref, rtol=2e-3, atol=2e-3)

    assert u_opt.shape == (n_batch, N * m) and y_opt.shape == (n_batch, N * p)
    print("KERNEL_OK")
</pallas_src>

<mosaic_0001>
module attributes {stable_mosaic.version = 11 : i64} {
  func.func @deepc_kernel(%arg0: i32, %arg1: memref<8x16xf32, #tpu.memory_space<vmem>>, %arg2: memref<8x16xf32, #tpu.memory_space<vmem>>, %arg3: memref<8x8xf32, #tpu.memory_space<vmem>>, %arg4: memref<8x8xf32, #tpu.memory_space<vmem>>, %arg5: memref<16x256xf32, #tpu.memory_space<vmem>>, %arg6: memref<16x256xf32, #tpu.memory_space<vmem>>, %arg7: memref<8x256xf32, #tpu.memory_space<vmem>>, %arg8: memref<8x256xf32, #tpu.memory_space<vmem>>, %arg9: memref<8x256xf32, #tpu.memory_space<vmem>>) attributes {dimension_semantics = [#tpu.dimension_semantics<parallel>], iteration_bounds = array<i64: 1>, scalar_prefetch = 0 : i64, scratch_operands = 0 : i64, tpu.core_type = #tpu.core_type<tc>, window_params = [{transform_indices = @transform_0, window_bounds = array<i64: 8, 16>}, {transform_indices = @transform_1, window_bounds = array<i64: 8, 16>}, {transform_indices = @transform_2, window_bounds = array<i64: 8, 8>}, {transform_indices = @transform_3, window_bounds = array<i64: 8, 8>}, {pipeline_mode = #tpu.pipeline_mode<synchronous>, transform_indices = @transform_4, window_bounds = array<i64: 16, 256>}, {pipeline_mode = #tpu.pipeline_mode<synchronous>, transform_indices = @transform_5, window_bounds = array<i64: 16, 256>}, {pipeline_mode = #tpu.pipeline_mode<synchronous>, transform_indices = @transform_6, window_bounds = array<i64: 8, 256>}, {pipeline_mode = #tpu.pipeline_mode<synchronous>, transform_indices = @transform_7, window_bounds = array<i64: 8, 256>}, {transform_indices = @transform_8, window_bounds = array<i64: 8, 256>}]} {
    %c0 = arith.constant 0 : index
    %c0_0 = arith.constant 0 : index
    %0 = vector.load %arg1[%c0, %c0_0] : memref<8x16xf32, #tpu.memory_space<vmem>>, vector<8x16xf32>
    %c0_1 = arith.constant 0 : index
    %c0_2 = arith.constant 0 : index
    %1 = vector.load %arg5[%c0_1, %c0_2] : memref<16x256xf32, #tpu.memory_space<vmem>>, vector<16x256xf32>
    %cst = arith.constant dense<0.000000e+00> : vector<8x256xf32>
    %2 = tpu.matmul %0, %1, %cst {dimension_numbers = #tpu.dot_dimension_numbers<[1], [0], [0], [1], [0, 0, 1, 1], [], []>} : vector<8x16xf32>, vector<16x256xf32>, vector<8x256xf32> -> vector<8x256xf32>
    %c0_3 = arith.constant 0 : index
    %c0_4 = arith.constant 0 : index
    %3 = vector.load %arg2[%c0_3, %c0_4] : memref<8x16xf32, #tpu.memory_space<vmem>>, vector<8x16xf32>
    %c0_5 = arith.constant 0 : index
    %c0_6 = arith.constant 0 : index
    %4 = vector.load %arg6[%c0_5, %c0_6] : memref<16x256xf32, #tpu.memory_space<vmem>>, vector<16x256xf32>
    %cst_7 = arith.constant dense<0.000000e+00> : vector<8x256xf32>
    %5 = tpu.matmul %3, %4, %cst_7 {dimension_numbers = #tpu.dot_dimension_numbers<[1], [0], [0], [1], [0, 0, 1, 1], [], []>} : vector<8x16xf32>, vector<16x256xf32>, vector<8x256xf32> -> vector<8x256xf32>
    %6 = arith.addf %2, %5 : vector<8x256xf32>
    %c0_8 = arith.constant 0 : index
    %c0_9 = arith.constant 0 : index
    %7 = vector.load %arg3[%c0_8, %c0_9] : memref<8x8xf32, #tpu.memory_space<vmem>>, vector<8x8xf32>
    %c0_10 = arith.constant 0 : index
    %c0_11 = arith.constant 0 : index
    %8 = vector.load %arg7[%c0_10, %c0_11] : memref<8x256xf32, #tpu.memory_space<vmem>>, vector<8x256xf32>
    %cst_12 = arith.constant dense<0.000000e+00> : vector<8x256xf32>
    %9 = tpu.matmul %7, %8, %cst_12 {dimension_numbers = #tpu.dot_dimension_numbers<[1], [0], [0], [1], [0, 0, 1, 1], [], []>} : vector<8x8xf32>, vector<8x256xf32>, vector<8x256xf32> -> vector<8x256xf32>
    %10 = arith.addf %6, %9 : vector<8x256xf32>
    %c0_13 = arith.constant 0 : index
    %c0_14 = arith.constant 0 : index
    %11 = vector.load %arg4[%c0_13, %c0_14] : memref<8x8xf32, #tpu.memory_space<vmem>>, vector<8x8xf32>
    %c0_15 = arith.constant 0 : index
    %c0_16 = arith.constant 0 : index
    %12 = vector.load %arg8[%c0_15, %c0_16] : memref<8x256xf32, #tpu.memory_space<vmem>>, vector<8x256xf32>
    %cst_17 = arith.constant dense<0.000000e+00> : vector<8x256xf32>
    %13 = tpu.matmul %11, %12, %cst_17 {dimension_numbers = #tpu.dot_dimension_numbers<[1], [0], [0], [1], [0, 0, 1, 1], [], []>} : vector<8x8xf32>, vector<8x256xf32>, vector<8x256xf32> -> vector<8x256xf32>
    %14 = arith.addf %10, %13 : vector<8x256xf32>
    %c0_18 = arith.constant 0 : index
    %c0_19 = arith.constant 0 : index
    %15 = vector.load %arg9[%c0_18, %c0_19] : memref<8x256xf32, #tpu.memory_space<vmem>>, vector<8x256xf32>
    tpu.vector_store %arg9[%c0_18, %c0_19], %14 {strides = array<i32>} : memref<8x256xf32, #tpu.memory_space<vmem>>, vector<8x256xf32>,
    return
  }
  func.func @transform_0(%arg0: i32) -> (i32, i32) {
    %c0_i32 = arith.constant 0 : i32
    %c0_i32_0 = arith.constant 0 : i32
    return %arg0, %c0_i32 : i32, i32
  }
  func.func @transform_1(%arg0: i32) -> (i32, i32) {
    %c0_i32 = arith.constant 0 : i32
    %c0_i32_0 = arith.constant 0 : i32
    return %arg0, %c0_i32 : i32, i32
  }
  func.func @transform_2(%arg0: i32) -> (i32, i32) {
    %c0_i32 = arith.constant 0 : i32
    %c0_i32_0 = arith.constant 0 : i32
    return %arg0, %c0_i32 : i32, i32
  }
  func.func @transform_3(%arg0: i32) -> (i32, i32) {
    %c0_i32 = arith.constant 0 : i32
    %c0_i32_0 = arith.constant 0 : i32
    return %arg0, %c0_i32 : i32, i32
  }
  func.func @transform_4(%arg0: i32) -> (i32, i32) {
    %c0_i32 = arith.constant 0 : i32
    %c0_i32_0 = arith.constant 0 : i32
    %c0_i32_1 = arith.constant 0 : i32
    return %c0_i32, %c0_i32_0 : i32, i32
  }
  func.func @transform_5(%arg0: i32) -> (i32, i32) {
    %c0_i32 = arith.constant 0 : i32
    %c0_i32_0 = arith.constant 0 : i32
    %c0_i32_1 = arith.constant 0 : i32
    return %c0_i32, %c0_i32_0 : i32, i32
  }
  func.func @transform_6(%arg0: i32) -> (i32, i32) {
    %c0_i32 = arith.constant 0 : i32
    %c0_i32_0 = arith.constant 0 : i32
    %c0_i32_1 = arith.constant 0 : i32
    return %c0_i32, %c0_i32_0 : i32, i32
  }
  func.func @transform_7(%arg0: i32) -> (i32, i32) {
    %c0_i32 = arith.constant 0 : i32
    %c0_i32_0 = arith.constant 0 : i32
    %c0_i32_1 = arith.constant 0 : i32
    return %c0_i32, %c0_i32_0 : i32, i32
  }
  func.func @transform_8(%arg0: i32) -> (i32, i32) {
    %c0_i32 = arith.constant 0 : i32
    %c0_i32_0 = arith.constant 0 : i32
    return %arg0, %c0_i32 : i32, i32
  }
}

</mosaic_0001>

<bundles_post_ra>
// kernel: _fwd.1
= control target key start
LH: loop header
LB: loop body
LE: loop exit
PB: predicated region body
PF: predicated region fallthrough
CT: control target
= control target key end

     0   :  { %13 = vsyncpa [#allocation3], 0  ;;  %s452_s0 = inlined_call_operand.vmem [shape: f32[8,16], index: 0, kind: input, shape index: {}]   ;;  %s453_s1 = inlined_call_operand.vmem [shape: f32[8,16], index: 1, kind: input, shape index: {}]   ;;  %s454_s2 = inlined_call_operand.vmem [shape: f32[8,8], index: 2, kind: input, shape index: {}]   ;;  %s455_s3 = inlined_call_operand.vmem [shape: f32[8,8], index: 3, kind: input, shape index: {}]   ;;  %s456_s4 = inlined_call_operand.vmem [shape: f32[16,256], index: 4, kind: input, shape index: {}]   ;;  %s457_s5 = inlined_call_operand.hbm [shape: f32[16,256], index: 5, kind: input, shape index: {}]   ;;  %s458_s6 = inlined_call_operand.hbm [shape: f32[8,256], index: 6, kind: input, shape index: {}]   ;;  %s459_s7 = inlined_call_operand.hbm [shape: f32[8,256], index: 7, kind: input, shape index: {}]   ;;  %s460_s8 = inlined_call_operand.vmem [shape: f32[8,256], index: 8, kind: output, shape index: {}]  }
   0x1   :  { %14 = vsyncpa [#allocation5], 0  ;;  %s43_s29 = sshll.u32 %s458_s6, 4  ;;  %s363_s30 = smov [#allocation4]   ;;  %s44_s29 = int_to_ptr.hbm [resolvable:$true] %s43_s29 }
   0x2   :  { %s45_s9 = sshll.u32 %s363_s30, 4  ;;  %s29_s12 = sshll.u32 %s457_s5, 4  ;;  %s46_s9 = int_to_ptr.vmem [resolvable:$true] %s45_s9  ;;  %s30_s12 = int_to_ptr.hbm [resolvable:$true] %s29_s12 }
   0x3   :  { %48 = dma.hbm_to_vmem [thread:$0]  %s44_s29, 256, %s46_s9, [#allocation5]  }
   0x4   :  { %s364_s13 = smov [#allocation2]   ;;  %s365_s15 = smov 256  }
   0x5   :  { %s31_s14 = sshll.u32 %s364_s13, 4  ;;  %s366_s16 = smov 16   ;;  %s32_s14 = int_to_ptr.vmem [resolvable:$true] %s31_s14 }
   0x6   :  { %37 = dma.hbm_to_vmem [thread:$0]  %s30_s12, 512, %s32_s14, [#allocation3], %s365_s15, %s365_s15, %s366_s16  }
   0x7   :  { %s54_s6 = sshll.u32 %s459_s7, 4  ;;  %s367_s19 = smov [#allocation6]   ;;  %s55_s6 = int_to_ptr.hbm [resolvable:$true] %s54_s6 }
   0x8   :  { %s56_s20 = sshll.u32 %s367_s19, 4  ;;  %s57_s20 = int_to_ptr.vmem [resolvable:$true] %s56_s20 }
   0x9   :  { %59 = dma.hbm_to_vmem [thread:$0]  %s55_s6, 256, %s57_s20, [#allocation5]  }
   0xa   :  { %359 = dma.done.wait [#allocation3], 512  }
   0xb   :  { %360 = vsyncadd [#allocation3], 4294966784 }
   0xc   :  { %361 = dma.done.wait [#allocation5], 512  }
   0xd   :  { %362 = vsyncadd [#allocation5], 4294966784  ;;  %v80_v0 = vld [vmem:[#allocation2 + $0x10] sm:$0xff]  ;;  %v81_v1 = vld [vmem:[#allocation2 + $0x18] sm:$0xff]  ;;  %vm82_vm0 = vcmask 130048   ;;  %vm172_vm1 = vcmask 64512  }
   0xe   :  { %v75_v2 = vld [vmem:[%s456_s4 + $0x10] sm:$0xff]  ;;  %100 = vmatpush.msra.mxu0 %v80_v0  ;;  %120 = vmatpush.msra.mxu1 %v81_v1  ;;  %v76_v3 = vld [vmem:[%s456_s4 + $0x18] sm:$0xff]  ;;  %v78_v4 = vld [vmem:[#allocation2] sm:$0xff] }
   0xf   :  { %v79_v5 = vld [vmem:[#allocation2 + $0x8] sm:$0xff]  ;;  %143 = vmatpush.msra.mxu2 %v75_v2  ;;  %163 = vmatpush.msra.mxu3 %v76_v3  ;;  %v73_v6 = vld [vmem:[%s456_s4] sm:$0xff]  ;;  %v219_v10 = vld [vmem:[#allocation6] sm:$0xff] }
  0x10   :  { %v74_v7 = vld [vmem:[%s456_s4 + $0x8] sm:$0xff]  ;;  %v77_v8 = vld [vmem:[%s453_s1] sm:$0xff]  ;;  %101 = vmatpush.msra.mxu0 %v78_v4  ;;  %121 = vmatpush.msra.mxu1 %v79_v5  ;;  %v220_v11 = vld [vmem:[#allocation6 + $0x8] sm:$0xff] }
  0x11   :  { %v72_v9 = vld [vmem:[%s452_s0] sm:$0xff]  ;;  %144 = vmatpush.msra.mxu2 %v73_v6  ;;  %164 = vmatpush.msra.mxu3 %v74_v7  ;;  %v171_v13 = vld [vmem:[#allocation4 + $0x8] sm:$0xff] }
  0x12   :  { %274 = vmatmul.msk.f32.vlgmr.msra.gmra.mxu0 %vm82_vm0, %v77_v8  ;;  %275 = vmatmul.msk.f32.vlgmr.msra.gmra.mxu1 %vm82_vm0, %v77_v8  ;;  %v170_v12 = vld [vmem:[#allocation4] sm:$0xff] }
  0x13   :  { %276 = vmatmul.msk.f32.vlgmr.msra.gmra.mxu2 %vm82_vm0, %v72_v9  ;;  %277 = vmatmul.msk.f32.vlgmr.msra.gmra.mxu3 %vm82_vm0, %v72_v9  ;;  %v169_v14 = vld [vmem:[%s454_s2] sm:$0xff] }
  0x14   :  { %239 = vmatpush.msrb.mxu2 %v219_v10  ;;  %259 = vmatpush.msrb.mxu3 %v220_v11  ;;  %v218_v15 = vld [vmem:[%s455_s3] sm:$0xff] }
  0x15   :  { %191 = vmatpush.msrb.mxu0 %v170_v12  ;;  %211 = vmatpush.msrb.mxu1 %v171_v13 }
  0x1a   :  { %278 = vmatmul.msk.f32.vlgmr.msrb.gmra.mxu0 %vm172_vm1, %v169_v14  ;;  %279 = vmatmul.msk.f32.vlgmr.msrb.gmra.mxu1 %vm172_vm1, %v169_v14 }
  0x1b   :  { %280 = vmatmul.msk.f32.vlgmr.msrb.gmra.mxu2 %vm172_vm1, %v218_v15  ;;  %281 = vmatmul.msk.f32.vlgmr.msrb.gmra.mxu3 %vm172_vm1, %v218_v15 }
  0x8f   :  { %v103_v16 = vpop.f32.mrf.mxu0  ;;  %v123_v17 = vpop.f32.mrf.mxu1 }
  0x96   :  { %v146_v18 = vpop.f32.mrf.mxu2  ;;  %v166_v19 = vpop.f32.mrf.mxu3 }
  0x97   :  { %v147_v20 = vadd.f32 %v146_v18, %v103_v16  ;;  %v167_v21 = vadd.f32 %v166_v19, %v123_v17  ;;  %v193_v22 = vpop.f32.mrf.mxu0  ;;  %v213_v23 = vpop.f32.mrf.mxu1 }
  0x99   :  { %v216_v24 = vadd.f32 %v193_v22, %v147_v20  ;;  %v217_v25 = vadd.f32 %v213_v23, %v167_v21 }
  0x9e   :  { %v241_v26 = vpop.f32.mrf.mxu2  ;;  %v261_v27 = vpop.f32.mrf.mxu3 }
  0x9f   :  { %v264_v28 = vadd.f32 %v241_v26, %v216_v24  ;;  %v265_v29 = vadd.f32 %v261_v27, %v217_v25 }
  0xa1   :  { %266 = vst [vmem:[%s460_s8] sm:$0xff] %v264_v28 }
  0xa2   :  { %267 = vst [vmem:[%s460_s8 + $0x8] sm:$0xff] %v265_v29 }
  0xa3   :  { %272 = vsyncpa [#allocation3], 1 }
  0xa4   :  { %273 = vsyncpa [#allocation5], 1 }

</bundles_post_ra>
